<compile_context>
chip_gen: v7x
topology: tpu7x:2x2x1
jax: 0.10.0
libtpu: 0.0.40
codegen_flags: <defaults>
</compile_context>

<pallas_src>
import numpy as np
import jax
import jax.numpy as jnp
from jax.experimental import pallas as pl
from jax.experimental.pallas import tpu as pltpu

HIDDEN = 16              # hidden_dim in the script
OUT = 1                  # output_dim in the script
LANES = 128              # TPU vreg lane width
PACK = LANES // HIDDEN   # 8 batch elements per 128-lane row


def _round_up(x, m):
    return ((x + m - 1) // m) * m


# ---------------------------------------------------------------- kernel ----

def prediction_kernel(node_ref, edge_ref, w_ref, sel_ref, bias_ref, out_ref):
    node = node_ref[...]                        # (R, 128): 8 batch elems per row
    edge = edge_ref[...]                        # (R, 128)
    # row 0 = W1.weight tiled x8 across lanes, row 1 = W2.weight tiled x8.
    w1 = w_ref[0:1, :]                          # (1, 128)
    w2 = w_ref[1:2, :]                          # (1, 128)
    fused = node * w1 + edge * w2               # VPU elementwise, (R, 128)
    # Segment-sum selector: sel[l, j] = 1 iff l // 16 == j.  One MXU matmul
    # reduces each 16-lane segment and compacts the 8 per-row results,
    # avoiding per-row cross-lane XLU reduces and a 1-lane-wide output store.
    seg = jnp.dot(fused, sel_ref[...],
                  preferred_element_type=jnp.float32)            # (R, 8)
    out_ref[...] = jnp.maximum(seg + bias_ref[...], 0.0)         # bias is (1,1)


# ------------------------------------------------ one-time param packing ----

def prepare_params(params):
    """Hoisted out of the hot path (per review): tile weights to lane width,
    build the segment-sum selector, pre-sum the three scalar biases."""
    w1 = params["w1"].reshape(-1)                                # (16,)  OUT==1
    w2 = params["w2"].reshape(-1)                                # (16,)
    w_tiled = jnp.stack([jnp.tile(w1, PACK), jnp.tile(w2, PACK)])        # (2, 128)
    sel = (jnp.arange(LANES)[:, None] // HIDDEN
           == jnp.arange(PACK)[None, :]).astype(jnp.float32)             # (128, 8)
    bias_sum = (params["b1"] + params["b2"] + params["bias"]).reshape(1, 1)
    return dict(w_tiled=w_tiled, selector=sel, bias_sum=bias_sum)


# --------------------------------------------------------------- wrapper ----

def prediction_forward(global_node_feature, global_edge_feature, prepared,
                       *, max_block_rows=512):
    B, H = global_node_feature.shape
    assert H == HIDDEN

    rows_needed = (B + PACK - 1) // PACK                 # rows after reshape
    block_rows = min(max_block_rows, _round_up(rows_needed, 8))
    rows_padded = _round_up(rows_needed, block_rows)
    b_padded = rows_padded * PACK

    node = global_node_feature
    edge = global_edge_feature
    if b_padded != B:
        pad = b_padded - B
        node = jnp.pad(node, ((0, pad), (0, 0)))
        edge = jnp.pad(edge, ((0, pad), (0, 0)))

    # Free row-major reshape: (b_padded, 16) -> (rows_padded, 128).
    node_r = node.reshape(rows_padded, LANES)
    edge_r = edge.reshape(rows_padded, LANES)

    grid = (rows_padded // block_rows,)
    data_spec = pl.BlockSpec((block_rows, LANES), lambda i: (i, 0))

    out = pl.pallas_call(
        prediction_kernel,
        out_shape=jax.ShapeDtypeStruct((rows_padded, PACK), jnp.float32),
        grid_spec=pltpu.PrefetchScalarGridSpec(
            num_scalar_prefetch=0,
            grid=grid,
            in_specs=[
                data_spec,                                       # node tiles
                data_spec,                                       # edge tiles
                pl.BlockSpec((2, LANES), lambda i: (0, 0)),      # weights (resident)
                pl.BlockSpec((LANES, PACK), lambda i: (0, 0)),   # selector (resident)
                pl.BlockSpec((1, 1), lambda i: (0, 0)),          # pre-summed bias
            ],
            out_specs=pl.BlockSpec((block_rows, PACK), lambda i: (i, 0)),
        ),
        compiler_params=pltpu.CompilerParams(
            dimension_semantics=("parallel",)),
    )(node_r, edge_r, prepared["w_tiled"], prepared["selector"],
      prepared["bias_sum"])

    # Free reshapes outside the kernel: drop padding, restore .view(-1, 1).
    return out.reshape(-1)[:B].reshape(B, OUT)


prediction_forward_jit = jax.jit(prediction_forward,
                                 static_argnames=("max_block_rows",))


# ---------------------------------------------------- deterministic params --

def init_params(key):
    k1, k2, k3, k4, k5 = jax.random.split(key, 5)
    bound = 1.0 / float(np.sqrt(HIDDEN))                 # nn.Linear default init
    w1 = jax.random.uniform(k1, (OUT, HIDDEN), jnp.float32, -bound, bound)
    b1 = jax.random.uniform(k2, (OUT,), jnp.float32, -bound, bound)
    w2 = jax.random.uniform(k3, (OUT, HIDDEN), jnp.float32, -bound, bound)
    b2 = jax.random.uniform(k4, (OUT,), jnp.float32, -bound, bound)
    bias = jax.random.uniform(k5, (OUT,), jnp.float32, 0.0, 1.0)  # torch.rand
    return dict(w1=w1, b1=b1, w2=w2, b2=b2, bias=bias)


# ----------------------------------------------------- pure-JAX reference ---

def reference(global_node_feature, global_edge_feature, params):
    node_out = global_node_feature @ params["w1"].T + params["b1"]
    edge_out = global_edge_feature @ params["w2"].T + params["b2"]
    combined = node_out + edge_out + params["bias"]
    return jnp.maximum(combined, 0.0).reshape(-1, 1)


# -------------------------------------------------------------------- main --

if __name__ == "__main__":
    key = jax.random.PRNGKey(0)
    kp, kn, ke, kn2, ke2 = jax.random.split(key, 5)
    params = init_params(kp)
    prepared = prepare_params(params)          # one-time packing, outside hot path

    # Small shape consistent with the module (hidden_dim=16), batch=8.
    B = 8
    global_node_feature = jax.random.uniform(kn, (B, HIDDEN), jnp.float32)
    global_edge_feature = jax.random.uniform(ke, (B, HIDDEN), jnp.float32)

    pred = prediction_forward_jit(global_node_feature, global_edge_feature, prepared)
    jax.block_until_ready(pred)

    ref = reference(global_node_feature, global_edge_feature, params)
    assert pred.shape == (B, OUT)
    assert np.allclose(np.asarray(pred), np.asarray(ref), atol=1e-5, rtol=1e-5)

    # Exercise the ragged-tail padding and the multi-step pipelined grid.
    B2 = 300
    node2 = jax.random.uniform(kn2, (B2, HIDDEN), jnp.float32)
    edge2 = jax.random.uniform(ke2, (B2, HIDDEN), jnp.float32)
    pred2 = prediction_forward_jit(node2, edge2, prepared, max_block_rows=8)
    jax.block_until_ready(pred2)
    ref2 = reference(node2, edge2, params)
    assert pred2.shape == (B2, OUT)
    assert np.allclose(np.asarray(pred2), np.asarray(ref2), atol=1e-5, rtol=1e-5)

    print("KERNEL_OK")
</pallas_src>

<mosaic_0001>
module attributes {stable_mosaic.version = 11 : i64} {
  func.func @prediction_kernel(%arg0: i32, %arg1: memref<8x128xf32, #tpu.memory_space<vmem>>, %arg2: memref<8x128xf32, #tpu.memory_space<vmem>>, %arg3: memref<2x128xf32, #tpu.memory_space<vmem>>, %arg4: memref<128x8xf32, #tpu.memory_space<vmem>>, %arg5: memref<1x1xf32, #tpu.memory_space<vmem>>, %arg6: memref<8x8xf32, #tpu.memory_space<vmem>>) attributes {dimension_semantics = [#tpu.dimension_semantics<parallel>], iteration_bounds = array<i64: 1>, scalar_prefetch = 0 : i64, scratch_operands = 0 : i64, tpu.core_type = #tpu.core_type<tc>, window_params = [{transform_indices = @transform_0, window_bounds = array<i64: 8, 128>}, {transform_indices = @transform_1, window_bounds = array<i64: 8, 128>}, {pipeline_mode = #tpu.pipeline_mode<synchronous>, transform_indices = @transform_2, window_bounds = array<i64: 2, 128>}, {pipeline_mode = #tpu.pipeline_mode<synchronous>, transform_indices = @transform_3, window_bounds = array<i64: 128, 8>}, {pipeline_mode = #tpu.pipeline_mode<synchronous>, transform_indices = @transform_4, window_bounds = array<i64: 1, 1>}, {transform_indices = @transform_5, window_bounds = array<i64: 8, 8>}]} {
    %c0 = arith.constant 0 : index
    %c0_0 = arith.constant 0 : index
    %0 = vector.load %arg1[%c0, %c0_0] : memref<8x128xf32, #tpu.memory_space<vmem>>, vector<8x128xf32>
    %c0_1 = arith.constant 0 : index
    %c0_2 = arith.constant 0 : index
    %1 = vector.load %arg2[%c0_1, %c0_2] : memref<8x128xf32, #tpu.memory_space<vmem>>, vector<8x128xf32>
    %c0_3 = arith.constant 0 : index
    %c0_4 = arith.constant 0 : index
    %2 = vector.load %arg3[%c0_3, %c0_4] : memref<2x128xf32, #tpu.memory_space<vmem>>, vector<1x128xf32>
    %c1 = arith.constant 1 : index
    %c0_5 = arith.constant 0 : index
    %3 = vector.load %arg3[%c1, %c0_5] : memref<2x128xf32, #tpu.memory_space<vmem>>, vector<1x128xf32>
    %4 = vector.broadcast %2 : vector<1x128xf32> to vector<8x128xf32>
    %5 = arith.mulf %0, %4 : vector<8x128xf32>
    %6 = vector.broadcast %3 : vector<1x128xf32> to vector<8x128xf32>
    %7 = arith.mulf %1, %6 : vector<8x128xf32>
    %8 = arith.addf %5, %7 : vector<8x128xf32>
    %c0_6 = arith.constant 0 : index
    %c0_7 = arith.constant 0 : index
    %9 = vector.load %arg4[%c0_6, %c0_7] : memref<128x8xf32, #tpu.memory_space<vmem>>, vector<128x8xf32>
    %cst = arith.constant dense<0.000000e+00> : vector<8x8xf32>
    %10 = tpu.matmul %8, %9, %cst {dimension_numbers = #tpu.dot_dimension_numbers<[1], [0], [0], [1], [0, 0, 1, 1], [], []>} : vector<8x128xf32>, vector<128x8xf32>, vector<8x8xf32> -> vector<8x8xf32>
    %c0_8 = arith.constant 0 : index
    %c0_9 = arith.constant 0 : index
    %11 = vector.load %arg5[%c0_8, %c0_9] : memref<1x1xf32, #tpu.memory_space<vmem>>, vector<1x1xf32>
    %12 = vector.broadcast %11 : vector<1x1xf32> to vector<8x8xf32>
    %13 = arith.addf %10, %12 : vector<8x8xf32>
    %cst_10 = arith.constant 0.000000e+00 : f32
    %14 = vector.broadcast %cst_10 : f32 to vector<8x8xf32>
    %15 = arith.maximumf %13, %14 : vector<8x8xf32>
    %c0_11 = arith.constant 0 : index
    %c0_12 = arith.constant 0 : index
    %16 = vector.load %arg6[%c0_11, %c0_12] : memref<8x8xf32, #tpu.memory_space<vmem>>, vector<8x8xf32>
    tpu.vector_store %arg6[%c0_11, %c0_12], %15 {strides = array<i32>} : memref<8x8xf32, #tpu.memory_space<vmem>>, vector<8x8xf32>,
    return
  }
  func.func @transform_0(%arg0: i32) -> (i32, i32) {
    %c0_i32 = arith.constant 0 : i32
    %c0_i32_0 = arith.constant 0 : i32
    return %arg0, %c0_i32 : i32, i32
  }
  func.func @transform_1(%arg0: i32) -> (i32, i32) {
    %c0_i32 = arith.constant 0 : i32
    %c0_i32_0 = arith.constant 0 : i32
    return %arg0, %c0_i32 : i32, i32
  }
  func.func @transform_2(%arg0: i32) -> (i32, i32) {
    %c0_i32 = arith.constant 0 : i32
    %c0_i32_0 = arith.constant 0 : i32
    %c0_i32_1 = arith.constant 0 : i32
    return %c0_i32, %c0_i32_0 : i32, i32
  }
  func.func @transform_3(%arg0: i32) -> (i32, i32) {
    %c0_i32 = arith.constant 0 : i32
    %c0_i32_0 = arith.constant 0 : i32
    %c0_i32_1 = arith.constant 0 : i32
    return %c0_i32, %c0_i32_0 : i32, i32
  }
  func.func @transform_4(%arg0: i32) -> (i32, i32) {
    %c0_i32 = arith.constant 0 : i32
    %c0_i32_0 = arith.constant 0 : i32
    %c0_i32_1 = arith.constant 0 : i32
    return %c0_i32, %c0_i32_0 : i32, i32
  }
  func.func @transform_5(%arg0: i32) -> (i32, i32) {
    %c0_i32 = arith.constant 0 : i32
    %c0_i32_0 = arith.constant 0 : i32
    return %arg0, %c0_i32 : i32, i32
  }
}

</mosaic_0001>

<bundles_post_ra>
// kernel: prediction_forward.1
= control target key start
LH: loop header
LB: loop body
LE: loop exit
PB: predicated region body
PF: predicated region fallthrough
CT: control target
= control target key end

     0   :  { %v224_v0 = vmov 0.0|0.0   ;;  %vm225_vm0 = vmmov 0   ;;  %v226_v4 = vmov 0.0   ;;  %v227_v8 = vmov 0   ;;  %s324_s3 = inlined_call_operand.vmem [shape: f32[128,8], index: 3, kind: input, shape index: {}]   ;;  %s325_s4 = inlined_call_operand.<no memory space> [shape: f32[1,1], index: 4, kind: input, shape index: {}]   ;;  %s326_s0 = inlined_call_operand.vmem [shape: f32[8,128], index: 0, kind: input, shape index: {}]   ;;  %s327_s1 = inlined_call_operand.vmem [shape: f32[8,128], index: 1, kind: input, shape index: {}]   ;;  %s328_s2 = inlined_call_operand.vmem [shape: f32[2,128], index: 2, kind: input, shape index: {}]   ;;  %s329_s5 = inlined_call_operand.vmem [shape: f32[8,8], index: 5, kind: output, shape index: {}]  }
   0x1   :  { %195 = vmatprep.subr.bf16.mxu0 %v224_v0  ;;  %v37_v1 = vld [vmem:[%s324_s3] sm:$0xff]  ;;  %v38_v2 = vld [vmem:[%s324_s3 + $0x8] sm:$0xff]  ;;  %v39_v3 = vld [vmem:[%s324_s3 + $0x10] sm:$0xff]  ;;  %192 = vmatprep.mubr.msk.f32.mxu0 %vm225_vm0, %v226_v4  ;;  %v10_v5 = vstv %s325_s4  ;;  %vm134_vm1 = vcmask 64512  }
   0x2   :  { %v196_v6 = vpack.c.bf16 %v38_v2, %v37_v1  ;;  %v40_v7 = vld [vmem:[%s324_s3 + $0x18] sm:$0xff]  ;;  %223 = vset.pattern.permute.xlu0 %v227_v8  ;;  %11 = vst [vmem:[#allocation2] sm:$0x1] %v10_v5  ;;  %v41_v10 = vld [vmem:[%s324_s3 + $0x20] sm:$0xff]  ;;  %v42_v11 = vld [vmem:[%s324_s3 + $0x28] sm:$0xff] }
   0x3   :  { %v199_v9 = vpack.c.bf16 %v40_v7, %v39_v3  ;;  %v202_v12 = vpack.c.bf16 %v42_v11, %v41_v10  ;;  %v43_v13 = vld [vmem:[%s324_s3 + $0x30] sm:$0xff]  ;;  %v44_v14 = vld [vmem:[%s324_s3 + $0x38] sm:$0xff]  ;;  %v45_v17 = vld [vmem:[%s324_s3 + $0x40] sm:$0xff] }
   0x4   :  { %197 = vmatpush3.bf16.msra.mxu0 %v196_v6  ;;  %v205_v16 = vpack.c.bf16 %v44_v14, %v43_v13  ;;  %v46_v18 = vld [vmem:[%s324_s3 + $0x48] sm:$0xff]  ;;  %v47_v20 = vld [vmem:[%s324_s3 + $0x50] sm:$0xff]  ;;  %v48_v21 = vld [vmem:[%s324_s3 + $0x58] sm:$0xff] }
   0x5   :  { %198 = vmatprep.subr.bf16.mxu0 %v224_v0  ;;  %v208_v19 = vpack.c.bf16 %v46_v18, %v45_v17  ;;  %v211_v22 = vpack.c.bf16 %v48_v21, %v47_v20  ;;  %v49_v23 = vld [vmem:[%s324_s3 + $0x60] sm:$0xff]  ;;  %v50_v24 = vld [vmem:[%s324_s3 + $0x68] sm:$0xff]  ;;  %v51_v30 = vld [vmem:[%s324_s3 + $0x70] sm:$0xff] }
   0x6   :  { %v22_v25 = vld [vmem:[%s326_s0] sm:$0xff]  ;;  %v214_v26 = vpack.c.bf16 %v50_v24, %v49_v23  ;;  %v52_v31 = vld [vmem:[%s324_s3 + $0x78] sm:$0xff] }
   0x7   :  { %v23_v27 = vld [vmem:[%s327_s1] sm:$0xff]  ;;  %v217_v34 = vpack.c.bf16 %v52_v31, %v51_v30 }
   0x8   :  { %200 = vmatpush3.bf16.msra.mxu0 %v199_v9  ;;  %v140_v28 = vld [vmem:[%s328_s2] ss:$0 sm:$0xff]  ;;  %v141_v29 = vld [vmem:[%s328_s2 + $0x1] ss:$0 sm:$0xff] }
   0x9   :  { %201 = vmatprep.subr.bf16.mxu0 %v224_v0  ;;  %v142_v15 = vld [vmem:[#allocation2] ss:$0 sm:$0xff]  ;;  %v30_v32 = vmul.f32 %v140_v28, %v22_v25  ;;  %v35_v33 = vmul.f32 %v141_v29, %v23_v27 }
   0xa   :  { %60 = vperm.xlu0 %223, %v142_v15  }
   0xb   :  { %v36_v35 = vadd.f32 %v35_v33, %v30_v32 }
   0xc   :  { %203 = vmatpush3.bf16.msra.mxu0 %v202_v12 }
   0xd   :  { %204 = vmatprep.subr.bf16.mxu0 %v224_v0 }
  0x10   :  { %206 = vmatpush3.bf16.msra.mxu0 %v205_v16 }
  0x11   :  { %207 = vmatprep.subr.bf16.mxu0 %v224_v0 }
  0x14   :  { %209 = vmatpush3.bf16.msra.mxu0 %v208_v19 }
  0x15   :  { %210 = vmatprep.subr.bf16.mxu0 %v224_v0 }
  0x18   :  { %212 = vmatpush3.bf16.msra.mxu0 %v211_v22 }
  0x19   :  { %213 = vmatprep.subr.bf16.mxu0 %v224_v0 }
  0x1c   :  { %215 = vmatpush3.bf16.msra.mxu0 %v214_v26 }
  0x1d   :  { %216 = vmatprep.subr.bf16.mxu0 %v224_v0 }
  0x20   :  { %218 = vmatpush3.bf16.msra.mxu0 %v217_v34 }
  0x23   :  { %193 = vmatmul.mubr.f32.vlgmr.msra.gmra.mrb[0].mxu0 %v36_v35 }
  0x89   :  { %v61_v36 = vpop.permute.xlu0 %60 }
  0xf6   :  { %v129_v37 = vpop.f32.mrb[0].mxu0 }
  0xf7   :  { %v130_v38 = vadd.f32 %v129_v37, %v61_v36  ;;  %v194_v39 = vpop.f32.mrb[1].mxu0 }
  0xf9   :  { %v133_v40 = vmax.f32 %v130_v38, 0.0 }
  0xfb   :  { %135 = vst.msk [vmem:[%s329_s5] sm:$0xff] %vm134_vm1, %v133_v40 }

</bundles_post_ra>
